<compile_context>
chip_gen: v5e
topology: v5e:2x2
jax: 0.10.0
libtpu: 0.0.40
codegen_flags: <defaults>
</compile_context>

<pallas_src>
import math

import jax
import jax.numpy as jnp
from jax.experimental import pallas as pl
from jax.experimental.pallas import tpu as pltpu

INV_SQRT2 = 1.0 / math.sqrt(2.0)


def _leaky(x, slope):
    return jnp.where(x >= 0, x, slope * x)


def _const_spec(shape):
    return pl.BlockSpec(shape, lambda n: (0,) * len(shape))


def _pick_block_images(n):
    """Images per grid step: amortize per-step overhead, but keep >=2 grid
    steps so v7x's 2 TensorCores both stay busy."""
    best = 1
    for b in range(1, min(n, 8) + 1):
        if n % b == 0 and n // b >= 2:
            best = b
    return best


# ------------------------------ Pallas kernels ------------------------------

def _make_stage1(B, Cin, Cout, Ho, Wo):
    """Down-conv(4x4,s2) + LReLU(0.1) + 1x1 bottle + first 3x3 conv + BN partials."""
    Ws2 = Wo + 2                    # row width incl. 2 junk columns
    Md = Ho * Ws2                   # pixels (lanes) computed per image
    b0 = Wo + 3                     # interior offset inside the pad scratch
    Nps = Md + 2 * b0               # per-image span in the pad scratch
    Cin4 = 4 * Cin
    down_shifts = (0, 1, Ws2, Ws2 + 1)                      # tap = a*2 + b
    conv_shifts = tuple((ky - 1) * Ws2 + (kx - 1)
                        for ky in range(3) for kx in range(3))

    def kernel(xs_ref, mask_ref, wd_ref, bd_ref, wb_ref, bb_ref, wc1_ref,
               bc1_ref, y0_ref, z_ref, stats_ref, dp_ref, cp_ref, pad_ref):
        mask = mask_ref[...]                                 # (1, Md) f32
        zero_border = jnp.zeros((Cout, b0), jnp.bfloat16)
        zsum = jnp.zeros((Cout, 1), jnp.float32)
        zsq = jnp.zeros((Cout, 1), jnp.float32)

        for i in range(B):
            # ---- 4x4/stride-2 down conv: one K = 16*Cin matmul ----
            for t, s in enumerate(down_shifts):
                dp_ref[t * Cin4:(t + 1) * Cin4, :] = xs_ref[i, :, pl.ds(s, Md)]
            h = jnp.dot(wd_ref[...], dp_ref[...],
                        preferred_element_type=jnp.float32)
            h = _leaky(h + bd_ref[...], 0.1)

            # ---- 1x1 bottle conv ----
            y0 = jnp.dot(wb_ref[...], h.astype(jnp.bfloat16),
                         preferred_element_type=jnp.float32) + bb_ref[...]
            y0_ref[i] = y0

            # ---- first 3x3 conv (pad=1): one K = 9*Cout matmul ----
            off = i * Nps
            pad_ref[:, pl.ds(off, b0)] = zero_border
            pad_ref[:, pl.ds(off + b0 + Md, b0)] = zero_border
            pad_ref[:, pl.ds(off + b0, Md)] = (y0 * mask).astype(jnp.bfloat16)
            for t, s in enumerate(conv_shifts):
                cp_ref[t * Cout:(t + 1) * Cout, :] = \
                    pad_ref[:, pl.ds(off + b0 + s, Md)]
            z = jnp.dot(wc1_ref[...], cp_ref[...],
                        preferred_element_type=jnp.float32) + bc1_ref[...]
            z_ref[i] = z.astype(jnp.bfloat16)

            # ---- BatchNorm partial sums over valid pixels only ----
            zm = z * mask
            zsum = zsum + jnp.sum(zm, axis=1, keepdims=True)
            zsq = zsq + jnp.sum(zm * zm, axis=1, keepdims=True)

        stats_ref[0, :, 0:1] = zsum
        stats_ref[0, :, 1:2] = zsq

    return kernel


def _make_stage2(B, Cout, Ho, Wo):
    """BN apply (batch stats) + LReLU(0.2) + second 3x3 conv + residual / sqrt(2)."""
    Ws2 = Wo + 2
    Md = Ho * Ws2
    b0 = Wo + 3
    Nps = Md + 2 * b0
    conv_shifts = tuple((ky - 1) * Ws2 + (kx - 1)
                        for ky in range(3) for kx in range(3))

    def kernel(z_ref, y0_ref, mask_ref, scale_ref, shift_ref, wc2_ref, bc2_ref,
               out_ref, cp_ref, pad_ref):
        mask = mask_ref[...]
        zero_border = jnp.zeros((Cout, b0), jnp.bfloat16)

        for i in range(B):
            a = _leaky(z_ref[i].astype(jnp.float32) * scale_ref[...]
                       + shift_ref[...], 0.2)
            off = i * Nps
            pad_ref[:, pl.ds(off, b0)] = zero_border
            pad_ref[:, pl.ds(off + b0 + Md, b0)] = zero_border
            pad_ref[:, pl.ds(off + b0, Md)] = (a * mask).astype(jnp.bfloat16)
            for t, s in enumerate(conv_shifts):
                cp_ref[t * Cout:(t + 1) * Cout, :] = \
                    pad_ref[:, pl.ds(off + b0 + s, Md)]
            z2 = jnp.dot(wc2_ref[...], cp_ref[...],
                         preferred_element_type=jnp.float32) + bc2_ref[...]
            out_ref[i] = (z2 + y0_ref[i]) * INV_SQRT2

    return kernel


# --------------------------- weight packing (once) ---------------------------

def pack_params(p):
    """One-time packing of PyTorch-layout weights into (C_out, K) matmul
    layouts matching the in-kernel patch construction (bf16 for the MXU)."""
    cm = p["down_w"].shape[0]          # down conv keeps channel count
    ci = p["down_w"].shape[1]
    co = p["bottle_w"].shape[0]

    # 4x4/s2 down conv -> (cm, 16*ci); column = (a*2+b)*4ci + (p*2+q)*ci + c,
    # value = down_w[cm, c, 2a+p, 2b+q]  (matches the space-to-depth patch).
    wd = p["down_w"].reshape(cm, ci, 2, 2, 2, 2)        # (cm, c, a, p, b, q)
    wd = jnp.transpose(wd, (0, 2, 4, 3, 5, 1))          # (cm, a, b, p, q, c)
    wd = wd.reshape(cm, 16 * ci)

    def w3(wt):  # (O, I, 3, 3) -> (O, 9*I); column = (ky*3+kx)*I + i
        return jnp.transpose(wt, (0, 2, 3, 1)).reshape(wt.shape[0],
                                                       9 * wt.shape[1])

    bf, f32 = jnp.bfloat16, jnp.float32
    return dict(
        wd=wd.astype(bf),
        bd=p["down_b"].reshape(cm, 1).astype(f32),
        wb=p["bottle_w"][:, :, 0, 0].astype(bf),
        bb=p["bottle_b"].reshape(co, 1).astype(f32),
        wc1=w3(p["dc1_w"]).astype(bf),
        bc1=p["dc1_b"].reshape(co, 1).astype(f32),
        gamma=p["bn_gamma"].astype(f32),
        beta=p["bn_beta"].astype(f32),
        wc2=w3(p["dc2_w"]).astype(bf),
        bc2=p["dc2_b"].reshape(co, 1).astype(f32),
    )


# ------------------------------ forward wrapper ------------------------------

def down_res_forward(x_nchw, w):
    N, Cin, H, W = x_nchw.shape
    assert H % 2 == 0 and W % 2 == 0
    Ho, Wo = H // 2, W // 2
    Hs2, Ws2 = Ho + 2, Wo + 2
    Npix = Hs2 * Ws2
    Md = Ho * Ws2
    b0 = Wo + 3
    Nps = Md + 2 * b0
    Cout = w["wb"].shape[0]
    B = _pick_block_images(N)
    NB = N // B

    # pad(1) for the conv plus extra bottom/right zeros so the space-to-depth
    # grid is (Ho+2, Wo+2); the extra zeros only feed junk columns.
    x = x_nchw.astype(jnp.float32)
    xp = jnp.pad(x, ((0, 0), (0, 0), (1, 3), (1, 3)))     # (N, Cin, H+4, W+4)
    xs = xp.reshape(N, Cin, Hs2, 2, Ws2, 2)               # (n, c, sy, p, sx, q)
    xs = jnp.transpose(xs, (0, 3, 5, 1, 2, 4))            # (n, p, q, c, sy, sx)
    xs = xs.reshape(N, 4 * Cin, Npix).astype(jnp.bfloat16)

    # valid-pixel mask along the lane axis (zeroes the 2 junk cols per row).
    mask = (jnp.arange(Md, dtype=jnp.int32) % Ws2 < Wo)
    mask = mask.astype(jnp.float32).reshape(1, Md)

    cparams = pltpu.CompilerParams(
        dimension_semantics=("parallel",),
        vmem_limit_bytes=32 * 1024 * 1024)

    stage1 = _make_stage1(B, Cin, Cout, Ho, Wo)
    y0, z, stats = pl.pallas_call(
        stage1,
        out_shape=(jax.ShapeDtypeStruct((N, Cout, Md), jnp.float32),
                   jax.ShapeDtypeStruct((N, Cout, Md), jnp.bfloat16),
                   jax.ShapeDtypeStruct((NB, Cout, 2), jnp.float32)),
        grid=(NB,),
        in_specs=[pl.BlockSpec((B, 4 * Cin, Npix), lambda n: (n, 0, 0)),
                  _const_spec((1, Md)),
                  _const_spec(w["wd"].shape), _const_spec(w["bd"].shape),
                  _const_spec(w["wb"].shape), _const_spec(w["bb"].shape),
                  _const_spec(w["wc1"].shape), _const_spec(w["bc1"].shape)],
        out_specs=(pl.BlockSpec((B, Cout, Md), lambda n: (n, 0, 0)),
                   pl.BlockSpec((B, Cout, Md), lambda n: (n, 0, 0)),
                   pl.BlockSpec((1, Cout, 2), lambda n: (n, 0, 0))),
        scratch_shapes=[pltpu.VMEM((16 * Cin, Md), jnp.bfloat16),   # down patch
                        pltpu.VMEM((9 * Cout, Md), jnp.bfloat16),   # 3x3 patch
                        pltpu.VMEM((Cout, B * Nps), jnp.bfloat16)], # pad scratch
        compiler_params=cparams,
    )(xs, mask, w["wd"], w["bd"], w["wb"], w["bb"], w["wc1"], w["bc1"])

    # ---- finalize training-mode BatchNorm batch statistics (per channel) ----
    s = jnp.sum(stats, axis=0)                       # (Cout, 2)
    cnt = float(N * Ho * Wo)
    mean = s[:, 0] / cnt
    var = jnp.maximum(s[:, 1] / cnt - mean * mean, 0.0)   # clamp cancellation
    rstd = jax.lax.rsqrt(var + 1e-5)
    scale = (w["gamma"] * rstd).reshape(Cout, 1)
    shift = (w["beta"] - mean * w["gamma"] * rstd).reshape(Cout, 1)

    stage2 = _make_stage2(B, Cout, Ho, Wo)
    out = pl.pallas_call(
        stage2,
        out_shape=jax.ShapeDtypeStruct((N, Cout, Md), jnp.float32),
        grid=(NB,),
        in_specs=[pl.BlockSpec((B, Cout, Md), lambda n: (n, 0, 0)),
                  pl.BlockSpec((B, Cout, Md), lambda n: (n, 0, 0)),
                  _const_spec((1, Md)),
                  _const_spec((Cout, 1)), _const_spec((Cout, 1)),
                  _const_spec(w["wc2"].shape), _const_spec(w["bc2"].shape)],
        out_specs=pl.BlockSpec((B, Cout, Md), lambda n: (n, 0, 0)),
        scratch_shapes=[pltpu.VMEM((9 * Cout, Md), jnp.bfloat16),
                        pltpu.VMEM((Cout, B * Nps), jnp.bfloat16)],
        compiler_params=cparams,
    )(z, y0, mask, scale, shift, w["wc2"], w["bc2"])

    # drop the 2 junk columns per spatial row; result is already NCHW.
    return out.reshape(N, Cout, Ho, Ws2)[:, :, :, :Wo]


# ------------------------ deterministic parameter init -----------------------

def init_params(key, cin, cout):
    ks = jax.random.split(key, 8)

    def u(k, shape, fan_in):
        bound = 1.0 / math.sqrt(fan_in)
        return jax.random.uniform(k, shape, jnp.float32, -bound, bound)

    return dict(
        down_w=u(ks[0], (cin, cin, 4, 4), cin * 16),
        down_b=u(ks[1], (cin,), cin * 16),
        bottle_w=u(ks[2], (cout, cin, 1, 1), cin),
        bottle_b=u(ks[3], (cout,), cin),
        dc1_w=u(ks[4], (cout, cout, 3, 3), cout * 9),
        dc1_b=u(ks[5], (cout,), cout * 9),
        bn_gamma=jnp.ones((cout,), jnp.float32),   # PyTorch BN default init
        bn_beta=jnp.zeros((cout,), jnp.float32),
        dc2_w=u(ks[6], (cout, cout, 3, 3), cout * 9),
        dc2_b=u(ks[7], (cout,), cout * 9),
    )


# -------------------------- pure-JAX reference check -------------------------

def _ref_conv(x, w, b, stride, pad):
    y = jax.lax.conv_general_dilated(
        x, w, (stride, stride), ((pad, pad), (pad, pad)),
        dimension_numbers=("NCHW", "OIHW", "NCHW"),
        precision=jax.lax.Precision.HIGHEST)
    return y + b[None, :, None, None]


def down_res_reference(x, p):
    h = _ref_conv(x, p["down_w"], p["down_b"], 2, 1)
    h = jnp.where(h >= 0, h, 0.1 * h)
    y0 = _ref_conv(h, p["bottle_w"], p["bottle_b"], 1, 0)
    z = _ref_conv(y0, p["dc1_w"], p["dc1_b"], 1, 1)
    mean = jnp.mean(z, axis=(0, 2, 3), keepdims=True)
    var = jnp.mean((z - mean) ** 2, axis=(0, 2, 3), keepdims=True)
    zn = (z - mean) * jax.lax.rsqrt(var + 1e-5)
    a = zn * p["bn_gamma"][None, :, None, None] + p["bn_beta"][None, :, None, None]
    a = jnp.where(a >= 0, a, 0.2 * a)
    z2 = _ref_conv(a, p["dc2_w"], p["dc2_b"], 1, 1)
    return (z2 + y0) / math.sqrt(2.0)


# ----------------------------------- main ------------------------------------

if __name__ == "__main__":
    key = jax.random.PRNGKey(0)
    kx, kp = jax.random.split(key)

    N, Cin, H, W = 2, 4, 16, 16
    Cout = 8
    x = jax.random.normal(kx, (N, Cin, H, W), jnp.float32)
    params = init_params(kp, Cin, Cout)
    packed = pack_params(params)          # hoisted out of the jitted forward

    out = jax.jit(down_res_forward)(x, packed)
    out = jax.block_until_ready(out)

    assert out.shape == (N, Cout, H // 2, W // 2), out.shape
    ref = down_res_reference(x, params)
    max_err = float(jnp.max(jnp.abs(out - ref)))
    assert jnp.allclose(out, ref, atol=1e-2, rtol=1e-2), max_err

    print("KERNEL_OK")
</pallas_src>

<mosaic_0001>
module attributes {stable_mosaic.version = 11 : i64} {
  func.func @kernel(%arg0: i32, %arg1: memref<1x16x100xbf16, #tpu.memory_space<vmem>>, %arg2: memref<1x80xf32, #tpu.memory_space<vmem>>, %arg3: memref<4x64xbf16, #tpu.memory_space<vmem>>, %arg4: memref<4x1xf32, #tpu.memory_space<vmem>>, %arg5: memref<8x4xbf16, #tpu.memory_space<vmem>>, %arg6: memref<8x1xf32, #tpu.memory_space<vmem>>, %arg7: memref<8x72xbf16, #tpu.memory_space<vmem>>, %arg8: memref<8x1xf32, #tpu.memory_space<vmem>>, %arg9: memref<1x8x80xf32, #tpu.memory_space<vmem>>, %arg10: memref<1x8x80xbf16, #tpu.memory_space<vmem>>, %arg11: memref<1x8x2xf32, #tpu.memory_space<vmem>>, %arg12: memref<64x80xbf16, #tpu.memory_space<vmem>>, %arg13: memref<72x80xbf16, #tpu.memory_space<vmem>>, %arg14: memref<8x102xbf16, #tpu.memory_space<vmem>>) attributes {dimension_semantics = [#tpu.dimension_semantics<parallel>], iteration_bounds = array<i64: 2>, scalar_prefetch = 0 : i64, scratch_operands = 3 : i64, tpu.core_type = #tpu.core_type<tc>, window_params = [{transform_indices = @transform_0, window_bounds = array<i64: 1, 16, 100>}, {pipeline_mode = #tpu.pipeline_mode<synchronous>, transform_indices = @transform_1, window_bounds = array<i64: 1, 80>}, {pipeline_mode = #tpu.pipeline_mode<synchronous>, transform_indices = @transform_2, window_bounds = array<i64: 4, 64>}, {pipeline_mode = #tpu.pipeline_mode<synchronous>, transform_indices = @transform_3, window_bounds = array<i64: 4, 1>}, {pipeline_mode = #tpu.pipeline_mode<synchronous>, transform_indices = @transform_4, window_bounds = array<i64: 8, 4>}, {pipeline_mode = #tpu.pipeline_mode<synchronous>, transform_indices = @transform_5, window_bounds = array<i64: 8, 1>}, {pipeline_mode = #tpu.pipeline_mode<synchronous>, transform_indices = @transform_6, window_bounds = array<i64: 8, 72>}, {pipeline_mode = #tpu.pipeline_mode<synchronous>, transform_indices = @transform_7, window_bounds = array<i64: 8, 1>}, {transform_indices = @transform_8, window_bounds = array<i64: 1, 8, 80>}, {transform_indices = @transform_9, window_bounds = array<i64: 1, 8, 80>}, {transform_indices = @transform_10, window_bounds = array<i64: 1, 8, 2>}]} {
    %c0 = arith.constant 0 : index
    %c0_0 = arith.constant 0 : index
    %0 = vector.load %arg2[%c0, %c0_0] : memref<1x80xf32, #tpu.memory_space<vmem>>, vector<1x80xf32>
    %cst = arith.constant 0.000000e+00 : bf16
    %1 = vector.broadcast %cst : bf16 to vector<8x11xbf16>
    %cst_1 = arith.constant 0.000000e+00 : f32
    %2 = vector.broadcast %cst_1 : f32 to vector<8x1xf32>
    %cst_2 = arith.constant 0.000000e+00 : f32
    %3 = vector.broadcast %cst_2 : f32 to vector<8x1xf32>
    %c0_3 = arith.constant 0 : index
    %c0_4 = arith.constant 0 : index
    %c0_5 = arith.constant 0 : index
    %4 = vector.load %arg1[%c0_3, %c0_4, %c0_5] : memref<1x16x100xbf16, #tpu.memory_space<vmem>>, vector<1x16x80xbf16>
    %5 = vector.shape_cast %4 : vector<1x16x80xbf16> to vector<16x80xbf16>
    %c0_6 = arith.constant 0 : index
    %c0_7 = arith.constant 0 : index
    %6 = vector.load %arg12[%c0_6, %c0_7] : memref<64x80xbf16, #tpu.memory_space<vmem>>, vector<16x80xbf16>
    tpu.vector_store %arg12[%c0_6, %c0_7], %5 {strides = array<i32>} : memref<64x80xbf16, #tpu.memory_space<vmem>>, vector<16x80xbf16>,
    %c0_8 = arith.constant 0 : index
    %c0_9 = arith.constant 0 : index
    %c1 = arith.constant 1 : index
    %7 = vector.load %arg1[%c0_8, %c0_9, %c1] : memref<1x16x100xbf16, #tpu.memory_space<vmem>>, vector<1x16x80xbf16>
    %8 = vector.shape_cast %7 : vector<1x16x80xbf16> to vector<16x80xbf16>
    %c16 = arith.constant 16 : index
    %c0_10 = arith.constant 0 : index
    %9 = vector.load %arg12[%c16, %c0_10] : memref<64x80xbf16, #tpu.memory_space<vmem>>, vector<16x80xbf16>
    tpu.vector_store %arg12[%c16, %c0_10], %8 {strides = array<i32>} : memref<64x80xbf16, #tpu.memory_space<vmem>>, vector<16x80xbf16>,
    %c0_11 = arith.constant 0 : index
    %c0_12 = arith.constant 0 : index
    %c10 = arith.constant 10 : index
    %10 = vector.load %arg1[%c0_11, %c0_12, %c10] : memref<1x16x100xbf16, #tpu.memory_space<vmem>>, vector<1x16x80xbf16>
    %11 = vector.shape_cast %10 : vector<1x16x80xbf16> to vector<16x80xbf16>
    %c32 = arith.constant 32 : index
    %c0_13 = arith.constant 0 : index
    %12 = vector.load %arg12[%c32, %c0_13] : memref<64x80xbf16, #tpu.memory_space<vmem>>, vector<16x80xbf16>
    tpu.vector_store %arg12[%c32, %c0_13], %11 {strides = array<i32>} : memref<64x80xbf16, #tpu.memory_space<vmem>>, vector<16x80xbf16>,
    %c0_14 = arith.constant 0 : index
    %c0_15 = arith.constant 0 : index
    %c11 = arith.constant 11 : index
    %13 = vector.load %arg1[%c0_14, %c0_15, %c11] : memref<1x16x100xbf16, #tpu.memory_space<vmem>>, vector<1x16x80xbf16>
    %14 = vector.shape_cast %13 : vector<1x16x80xbf16> to vector<16x80xbf16>
    %c48 = arith.constant 48 : index
    %c0_16 = arith.constant 0 : index
    %15 = vector.load %arg12[%c48, %c0_16] : memref<64x80xbf16, #tpu.memory_space<vmem>>, vector<16x80xbf16>
    tpu.vector_store %arg12[%c48, %c0_16], %14 {strides = array<i32>} : memref<64x80xbf16, #tpu.memory_space<vmem>>, vector<16x80xbf16>,
    %c0_17 = arith.constant 0 : index
    %c0_18 = arith.constant 0 : index
    %16 = vector.load %arg3[%c0_17, %c0_18] : memref<4x64xbf16, #tpu.memory_space<vmem>>, vector<4x64xbf16>
    %c0_19 = arith.constant 0 : index
    %c0_20 = arith.constant 0 : index
    %17 = vector.load %arg12[%c0_19, %c0_20] : memref<64x80xbf16, #tpu.memory_space<vmem>>, vector<64x80xbf16>
    %cst_21 = arith.constant dense<0.000000e+00> : vector<4x80xf32>
    %18 = tpu.matmul %16, %17, %cst_21 {dimension_numbers = #tpu.dot_dimension_numbers<[1], [0], [0], [1], [0, 0, 1, 1], [], []>} : vector<4x64xbf16>, vector<64x80xbf16>, vector<4x80xf32> -> vector<4x80xf32>
    %c0_22 = arith.constant 0 : index
    %c0_23 = arith.constant 0 : index
    %19 = vector.load %arg4[%c0_22, %c0_23] : memref<4x1xf32, #tpu.memory_space<vmem>>, vector<4x1xf32>
    %20 = vector.broadcast %19 : vector<4x1xf32> to vector<4x80xf32>
    %21 = arith.addf %18, %20 : vector<4x80xf32>
    %cst_24 = arith.constant 0.000000e+00 : f32
    %22 = vector.broadcast %cst_24 : f32 to vector<4x80xf32>
    %23 = arith.cmpf oge, %21, %22 : vector<4x80xf32>
    %cst_25 = arith.constant 1.000000e-01 : f32
    %24 = vector.broadcast %cst_25 : f32 to vector<4x80xf32>
    %25 = arith.mulf %24, %21 : vector<4x80xf32>
    %26 = arith.select %23, %21, %25 : vector<4x80xi1>, vector<4x80xf32>
    %c0_26 = arith.constant 0 : index
    %c0_27 = arith.constant 0 : index
    %27 = vector.load %arg5[%c0_26, %c0_27] : memref<8x4xbf16, #tpu.memory_space<vmem>>, vector<8x4xbf16>
    %28 = arith.truncf %26 : vector<4x80xf32> to vector<4x80xbf16>
    %cst_28 = arith.constant dense<0.000000e+00> : vector<8x80xf32>
    %29 = tpu.matmul %27, %28, %cst_28 {dimension_numbers = #tpu.dot_dimension_numbers<[1], [0], [0], [1], [0, 0, 1, 1], [], []>} : vector<8x4xbf16>, vector<4x80xbf16>, vector<8x80xf32> -> vector<8x80xf32>
    %c0_29 = arith.constant 0 : index
    %c0_30 = arith.constant 0 : index
    %30 = vector.load %arg6[%c0_29, %c0_30] : memref<8x1xf32, #tpu.memory_space<vmem>>, vector<8x1xf32>
    %31 = vector.broadcast %30 : vector<8x1xf32> to vector<8x80xf32>
    %32 = arith.addf %29, %31 : vector<8x80xf32>
    %c0_31 = arith.constant 0 : index
    %c0_32 = arith.constant 0 : index
    %c0_33 = arith.constant 0 : index
    %33 = vector.load %arg9[%c0_31, %c0_32, %c0_33] : memref<1x8x80xf32, #tpu.memory_space<vmem>>, vector<1x8x80xf32>
    %34 = vector.shape_cast %33 : vector<1x8x80xf32> to vector<8x80xf32>
    %35 = vector.shape_cast %32 : vector<8x80xf32> to vector<1x8x80xf32>
    tpu.vector_store %arg9[%c0_31, %c0_32, %c0_33], %35 {strides = array<i32>} : memref<1x8x80xf32, #tpu.memory_space<vmem>>, vector<1x8x80xf32>,
    %c0_34 = arith.constant 0 : index
    %c0_35 = arith.constant 0 : index
    %36 = vector.load %arg14[%c0_34, %c0_35] : memref<8x102xbf16, #tpu.memory_space<vmem>>, vector<8x11xbf16>
    tpu.vector_store %arg14[%c0_34, %c0_35], %1 {strides = array<i32>} : memref<8x102xbf16, #tpu.memory_space<vmem>>, vector<8x11xbf16>,
    %c0_36 = arith.constant 0 : index
    %c91 = arith.constant 91 : index
    %37 = vector.load %arg14[%c0_36, %c91] : memref<8x102xbf16, #tpu.memory_space<vmem>>, vector<8x11xbf16>
    tpu.vector_store %arg14[%c0_36, %c91], %1 {strides = array<i32>} : memref<8x102xbf16, #tpu.memory_space<vmem>>, vector<8x11xbf16>,
    %38 = vector.broadcast %0 : vector<1x80xf32> to vector<8x80xf32>
    %39 = arith.mulf %32, %38 : vector<8x80xf32>
    %40 = arith.truncf %39 : vector<8x80xf32> to vector<8x80xbf16>
    %c0_37 = arith.constant 0 : index
    %c11_38 = arith.constant 11 : index
    %41 = vector.load %arg14[%c0_37, %c11_38] : memref<8x102xbf16, #tpu.memory_space<vmem>>, vector<8x80xbf16>
    tpu.vector_store %arg14[%c0_37, %c11_38], %40 {strides = array<i32>} : memref<8x102xbf16, #tpu.memory_space<vmem>>, vector<8x80xbf16>,
    %c0_39 = arith.constant 0 : index
    %c0_40 = arith.constant 0 : index
    %42 = vector.load %arg14[%c0_39, %c0_40] : memref<8x102xbf16, #tpu.memory_space<vmem>>, vector<8x80xbf16>
    %c0_41 = arith.constant 0 : index
    %c0_42 = arith.constant 0 : index
    %43 = vector.load %arg13[%c0_41, %c0_42] : memref<72x80xbf16, #tpu.memory_space<vmem>>, vector<8x80xbf16>
    tpu.vector_store %arg13[%c0_41, %c0_42], %42 {strides = array<i32>} : memref<72x80xbf16, #tpu.memory_space<vmem>>, vector<8x80xbf16>,
    %c0_43 = arith.constant 0 : index
    %c1_44 = arith.constant 1 : index
    %44 = vector.load %arg14[%c0_43, %c1_44] : memref<8x102xbf16, #tpu.memory_space<vmem>>, vector<8x80xbf16>
    %c8 = arith.constant 8 : index
    %c0_45 = arith.constant 0 : index
    %45 = vector.load %arg13[%c8, %c0_45] : memref<72x80xbf16, #tpu.memory_space<vmem>>, vector<8x80xbf16>
    tpu.vector_store %arg13[%c8, %c0_45], %44 {strides = array<i32>} : memref<72x80xbf16, #tpu.memory_space<vmem>>, vector<8x80xbf16>,
    %c0_46 = arith.constant 0 : index
    %c2 = arith.constant 2 : index
    %46 = vector.load %arg14[%c0_46, %c2] : memref<8x102xbf16, #tpu.memory_space<vmem>>, vector<8x80xbf16>
    %c16_47 = arith.constant 16 : index
    %c0_48 = arith.constant 0 : index
    %47 = vector.load %arg13[%c16_47, %c0_48] : memref<72x80xbf16, #tpu.memory_space<vmem>>, vector<8x80xbf16>
    tpu.vector_store %arg13[%c16_47, %c0_48], %46 {strides = array<i32>} : memref<72x80xbf16, #tpu.memory_space<vmem>>, vector<8x80xbf16>,
    %c0_49 = arith.constant 0 : index
    %c10_50 = arith.constant 10 : index
    %48 = vector.load %arg14[%c0_49, %c10_50] : memref<8x102xbf16, #tpu.memory_space<vmem>>, vector<8x80xbf16>
    %c24 = arith.constant 24 : index
    %c0_51 = arith.constant 0 : index
    %49 = vector.load %arg13[%c24, %c0_51] : memref<72x80xbf16, #tpu.memory_space<vmem>>, vector<8x80xbf16>
    tpu.vector_store %arg13[%c24, %c0_51], %48 {strides = array<i32>} : memref<72x80xbf16, #tpu.memory_space<vmem>>, vector<8x80xbf16>,
    %c0_52 = arith.constant 0 : index
    %c11_53 = arith.constant 11 : index
    %50 = vector.load %arg14[%c0_52, %c11_53] : memref<8x102xbf16, #tpu.memory_space<vmem>>, vector<8x80xbf16>
    %c32_54 = arith.constant 32 : index
    %c0_55 = arith.constant 0 : index
    %51 = vector.load %arg13[%c32_54, %c0_55] : memref<72x80xbf16, #tpu.memory_space<vmem>>, vector<8x80xbf16>
    tpu.vector_store %arg13[%c32_54, %c0_55], %50 {strides = array<i32>} : memref<72x80xbf16, #tpu.memory_space<vmem>>, vector<8x80xbf16>,
    %c0_56 = arith.constant 0 : index
    %c12 = arith.constant 12 : index
    %52 = vector.load %arg14[%c0_56, %c12] : memref<8x102xbf16, #tpu.memory_space<vmem>>, vector<8x80xbf16>
    %c40 = arith.constant 40 : index
    %c0_57 = arith.constant 0 : index
    %53 = vector.load %arg13[%c40, %c0_57] : memref<72x80xbf16, #tpu.memory_space<vmem>>, vector<8x80xbf16>
    tpu.vector_store %arg13[%c40, %c0_57], %52 {strides = array<i32>} : memref<72x80xbf16, #tpu.memory_space<vmem>>, vector<8x80xbf16>,
    %c0_58 = arith.constant 0 : index
    %c20 = arith.constant 20 : index
    %54 = vector.load %arg14[%c0_58, %c20] : memref<8x102xbf16, #tpu.memory_space<vmem>>, vector<8x80xbf16>
    %c48_59 = arith.constant 48 : index
    %c0_60 = arith.constant 0 : index
    %55 = vector.load %arg13[%c48_59, %c0_60] : memref<72x80xbf16, #tpu.memory_space<vmem>>, vector<8x80xbf16>
    tpu.vector_store %arg13[%c48_59, %c0_60], %54 {strides = array<i32>} : memref<72x80xbf16, #tpu.memory_space<vmem>>, vector<8x80xbf16>,
    %c0_61 = arith.constant 0 : index
    %c21 = arith.constant 21 : index
    %56 = vector.load %arg14[%c0_61, %c21] : memref<8x102xbf16, #tpu.memory_space<vmem>>, vector<8x80xbf16>
    %c56 = arith.constant 56 : index
    %c0_62 = arith.constant 0 : index
    %57 = vector.load %arg13[%c56, %c0_62] : memref<72x80xbf16, #tpu.memory_space<vmem>>, vector<8x80xbf16>
    tpu.vector_store %arg13[%c56, %c0_62], %56 {strides = array<i32>} : memref<72x80xbf16, #tpu.memory_space<vmem>>, vector<8x80xbf16>,
    %c0_63 = arith.constant 0 : index
    %c22 = arith.constant 22 : index
    %58 = vector.load %arg14[%c0_63, %c22] : memref<8x102xbf16, #tpu.memory_space<vmem>>, vector<8x80xbf16>
    %c64 = arith.constant 64 : index
    %c0_64 = arith.constant 0 : index
    %59 = vector.load %arg13[%c64, %c0_64] : memref<72x80xbf16, #tpu.memory_space<vmem>>, vector<8x80xbf16>
    tpu.vector_store %arg13[%c64, %c0_64], %58 {strides = array<i32>} : memref<72x80xbf16, #tpu.memory_space<vmem>>, vector<8x80xbf16>,
    %c0_65 = arith.constant 0 : index
    %c0_66 = arith.constant 0 : index
    %60 = vector.load %arg7[%c0_65, %c0_66] : memref<8x72xbf16, #tpu.memory_space<vmem>>, vector<8x72xbf16>
    %c0_67 = arith.constant 0 : index
    %c0_68 = arith.constant 0 : index
    %61 = vector.load %arg13[%c0_67, %c0_68] : memref<72x80xbf16, #tpu.memory_space<vmem>>, vector<72x80xbf16>
    %cst_69 = arith.constant dense<0.000000e+00> : vector<8x80xf32>
    %62 = tpu.matmul %60, %61, %cst_69 {dimension_numbers = #tpu.dot_dimension_numbers<[1], [0], [0], [1], [0, 0, 1, 1], [], []>} : vector<8x72xbf16>, vector<72x80xbf16>, vector<8x80xf32> -> vector<8x80xf32>
    %c0_70 = arith.constant 0 : index
    %c0_71 = arith.constant 0 : index
    %63 = vector.load %arg8[%c0_70, %c0_71] : memref<8x1xf32, #tpu.memory_space<vmem>>, vector<8x1xf32>
    %64 = vector.broadcast %63 : vector<8x1xf32> to vector<8x80xf32>
    %65 = arith.addf %62, %64 : vector<8x80xf32>
    %66 = arith.truncf %65 : vector<8x80xf32> to vector<8x80xbf16>
    %c0_72 = arith.constant 0 : index
    %c0_73 = arith.constant 0 : index
    %c0_74 = arith.constant 0 : index
    %67 = vector.load %arg10[%c0_72, %c0_73, %c0_74] : memref<1x8x80xbf16, #tpu.memory_space<vmem>>, vector<1x8x80xbf16>
    %68 = vector.shape_cast %67 : vector<1x8x80xbf16> to vector<8x80xbf16>
    %69 = vector.shape_cast %66 : vector<8x80xbf16> to vector<1x8x80xbf16>
    tpu.vector_store %arg10[%c0_72, %c0_73, %c0_74], %69 {strides = array<i32>} : memref<1x8x80xbf16, #tpu.memory_space<vmem>>, vector<1x8x80xbf16>,
    %70 = vector.broadcast %0 : vector<1x80xf32> to vector<8x80xf32>
    %71 = arith.mulf %65, %70 : vector<8x80xf32>
    %cst_75 = arith.constant dense<0.000000e+00> : vector<8xf32>
    %72 = vector.multi_reduction <add>, %71, %cst_75 [1] : vector<8x80xf32> to vector<8xf32>
    %73 = vector.shape_cast %72 : vector<8xf32> to vector<8x1xf32>
    %74 = arith.addf %2, %73 : vector<8x1xf32>
    %75 = arith.mulf %71, %71 : vector<8x80xf32>
    %cst_76 = arith.constant dense<0.000000e+00> : vector<8xf32>
    %76 = vector.multi_reduction <add>, %75, %cst_76 [1] : vector<8x80xf32> to vector<8xf32>
    %77 = vector.shape_cast %76 : vector<8xf32> to vector<8x1xf32>
    %78 = arith.addf %3, %77 : vector<8x1xf32>
    %c0_77 = arith.constant 0 : index
    %c0_78 = arith.constant 0 : index
    %c0_79 = arith.constant 0 : index
    %79 = vector.load %arg11[%c0_77, %c0_78, %c0_79] : memref<1x8x2xf32, #tpu.memory_space<vmem>>, vector<1x8x1xf32>
    %80 = vector.shape_cast %79 : vector<1x8x1xf32> to vector<8x1xf32>
    %81 = vector.shape_cast %74 : vector<8x1xf32> to vector<1x8x1xf32>
    tpu.vector_store %arg11[%c0_77, %c0_78, %c0_79], %81 {strides = array<i32>} : memref<1x8x2xf32, #tpu.memory_space<vmem>>, vector<1x8x1xf32>,
    %c0_80 = arith.constant 0 : index
    %c0_81 = arith.constant 0 : index
    %c1_82 = arith.constant 1 : index
    %82 = vector.load %arg11[%c0_80, %c0_81, %c1_82] : memref<1x8x2xf32, #tpu.memory_space<vmem>>, vector<1x8x1xf32>
    %83 = vector.shape_cast %82 : vector<1x8x1xf32> to vector<8x1xf32>
    %84 = vector.shape_cast %78 : vector<8x1xf32> to vector<1x8x1xf32>
    tpu.vector_store %arg11[%c0_80, %c0_81, %c1_82], %84 {strides = array<i32>} : memref<1x8x2xf32, #tpu.memory_space<vmem>>, vector<1x8x1xf32>,
    return
  }
  func.func @transform_0(%arg0: i32) -> (i32, i32, i32) {
    %c0_i32 = arith.constant 0 : i32
    %c0_i32_0 = arith.constant 0 : i32
    %c0_i32_1 = arith.constant 0 : i32
    return %arg0, %c0_i32, %c0_i32_0 : i32, i32, i32
  }
  func.func @transform_1(%arg0: i32) -> (i32, i32) {
    %c0_i32 = arith.constant 0 : i32
    %c0_i32_0 = arith.constant 0 : i32
    %c0_i32_1 = arith.constant 0 : i32
    return %c0_i32, %c0_i32_0 : i32, i32
  }
  func.func @transform_2(%arg0: i32) -> (i32, i32) {
    %c0_i32 = arith.constant 0 : i32
    %c0_i32_0 = arith.constant 0 : i32
    %c0_i32_1 = arith.constant 0 : i32
    return %c0_i32, %c0_i32_0 : i32, i32
  }
  func.func @transform_3(%arg0: i32) -> (i32, i32) {
    %c0_i32 = arith.constant 0 : i32
    %c0_i32_0 = arith.constant 0 : i32
    %c0_i32_1 = arith.constant 0 : i32
    return %c0_i32, %c0_i32_0 : i32, i32
  }
  func.func @transform_4(%arg0: i32) -> (i32, i32) {
    %c0_i32 = arith.constant 0 : i32
    %c0_i32_0 = arith.constant 0 : i32
    %c0_i32_1 = arith.constant 0 : i32
    return %c0_i32, %c0_i32_0 : i32, i32
  }
  func.func @transform_5(%arg0: i32) -> (i32, i32) {
    %c0_i32 = arith.constant 0 : i32
    %c0_i32_0 = arith.constant 0 : i32
    %c0_i32_1 = arith.constant 0 : i32
    return %c0_i32, %c0_i32_0 : i32, i32
  }
  func.func @transform_6(%arg0: i32) -> (i32, i32) {
    %c0_i32 = arith.constant 0 : i32
    %c0_i32_0 = arith.constant 0 : i32
    %c0_i32_1 = arith.constant 0 : i32
    return %c0_i32, %c0_i32_0 : i32, i32
  }
  func.func @transform_7(%arg0: i32) -> (i32, i32) {
    %c0_i32 = arith.constant 0 : i32
    %c0_i32_0 = arith.constant 0 : i32
    %c0_i32_1 = arith.constant 0 : i32
    return %c0_i32, %c0_i32_0 : i32, i32
  }
  func.func @transform_8(%arg0: i32) -> (i32, i32, i32) {
    %c0_i32 = arith.constant 0 : i32
    %c0_i32_0 = arith.constant 0 : i32
    %c0_i32_1 = arith.constant 0 : i32
    return %arg0, %c0_i32, %c0_i32_0 : i32, i32, i32
  }
  func.func @transform_9(%arg0: i32) -> (i32, i32, i32) {
    %c0_i32 = arith.constant 0 : i32
    %c0_i32_0 = arith.constant 0 : i32
    %c0_i32_1 = arith.constant 0 : i32
    return %arg0, %c0_i32, %c0_i32_0 : i32, i32, i32
  }
  func.func @transform_10(%arg0: i32) -> (i32, i32, i32) {
    %c0_i32 = arith.constant 0 : i32
    %c0_i32_0 = arith.constant 0 : i32
    %c0_i32_1 = arith.constant 0 : i32
    return %arg0, %c0_i32, %c0_i32_0 : i32, i32, i32
  }
}

module attributes {stable_mosaic.version = 11 : i64} {
  func.func @kernel(%arg0: i32, %arg1: memref<1x8x80xbf16, #tpu.memory_space<vmem>>, %arg2: memref<1x8x80xf32, #tpu.memory_space<vmem>>, %arg3: memref<1x80xf32, #tpu.memory_space<vmem>>, %arg4: memref<8x1xf32, #tpu.memory_space<vmem>>, %arg5: memref<8x1xf32, #tpu.memory_space<vmem>>, %arg6: memref<8x72xbf16, #tpu.memory_space<vmem>>, %arg7: memref<8x1xf32, #tpu.memory_space<vmem>>, %arg8: memref<1x8x80xf32, #tpu.memory_space<vmem>>, %arg9: memref<72x80xbf16, #tpu.memory_space<vmem>>, %arg10: memref<8x102xbf16, #tpu.memory_space<vmem>>) attributes {dimension_semantics = [#tpu.dimension_semantics<parallel>], iteration_bounds = array<i64: 2>, scalar_prefetch = 0 : i64, scratch_operands = 2 : i64, tpu.core_type = #tpu.core_type<tc>, window_params = [{transform_indices = @transform_0, window_bounds = array<i64: 1, 8, 80>}, {transform_indices = @transform_1, window_bounds = array<i64: 1, 8, 80>}, {pipeline_mode = #tpu.pipeline_mode<synchronous>, transform_indices = @transform_2, window_bounds = array<i64: 1, 80>}, {pipeline_mode = #tpu.pipeline_mode<synchronous>, transform_indices = @transform_3, window_bounds = array<i64: 8, 1>}, {pipeline_mode = #tpu.pipeline_mode<synchronous>, transform_indices = @transform_4, window_bounds = array<i64: 8, 1>}, {pipeline_mode = #tpu.pipeline_mode<synchronous>, transform_indices = @transform_5, window_bounds = array<i64: 8, 72>}, {pipeline_mode = #tpu.pipeline_mode<synchronous>, transform_indices = @transform_6, window_bounds = array<i64: 8, 1>}, {transform_indices = @transform_7, window_bounds = array<i64: 1, 8, 80>}]} {
    %c0 = arith.constant 0 : index
    %c0_0 = arith.constant 0 : index
    %0 = vector.load %arg3[%c0, %c0_0] : memref<1x80xf32, #tpu.memory_space<vmem>>, vector<1x80xf32>
    %cst = arith.constant 0.000000e+00 : bf16
    %1 = vector.broadcast %cst : bf16 to vector<8x11xbf16>
    %c0_1 = arith.constant 0 : index
    %c0_2 = arith.constant 0 : index
    %c0_3 = arith.constant 0 : index
    %2 = vector.load %arg1[%c0_1, %c0_2, %c0_3] : memref<1x8x80xbf16, #tpu.memory_space<vmem>>, vector<1x8x80xbf16>
    %3 = vector.shape_cast %2 : vector<1x8x80xbf16> to vector<8x80xbf16>
    %4 = arith.extf %3 : vector<8x80xbf16> to vector<8x80xf32>
    %c0_4 = arith.constant 0 : index
    %c0_5 = arith.constant 0 : index
    %5 = vector.load %arg4[%c0_4, %c0_5] : memref<8x1xf32, #tpu.memory_space<vmem>>, vector<8x1xf32>
    %6 = vector.broadcast %5 : vector<8x1xf32> to vector<8x80xf32>
    %7 = arith.mulf %4, %6 : vector<8x80xf32>
    %c0_6 = arith.constant 0 : index
    %c0_7 = arith.constant 0 : index
    %8 = vector.load %arg5[%c0_6, %c0_7] : memref<8x1xf32, #tpu.memory_space<vmem>>, vector<8x1xf32>
    %9 = vector.broadcast %8 : vector<8x1xf32> to vector<8x80xf32>
    %10 = arith.addf %7, %9 : vector<8x80xf32>
    %cst_8 = arith.constant 0.000000e+00 : f32
    %11 = vector.broadcast %cst_8 : f32 to vector<8x80xf32>
    %12 = arith.cmpf oge, %10, %11 : vector<8x80xf32>
    %cst_9 = arith.constant 2.000000e-01 : f32
    %13 = vector.broadcast %cst_9 : f32 to vector<8x80xf32>
    %14 = arith.mulf %13, %10 : vector<8x80xf32>
    %15 = arith.select %12, %10, %14 : vector<8x80xi1>, vector<8x80xf32>
    %c0_10 = arith.constant 0 : index
    %c0_11 = arith.constant 0 : index
    %16 = vector.load %arg10[%c0_10, %c0_11] : memref<8x102xbf16, #tpu.memory_space<vmem>>, vector<8x11xbf16>
    tpu.vector_store %arg10[%c0_10, %c0_11], %1 {strides = array<i32>} : memref<8x102xbf16, #tpu.memory_space<vmem>>, vector<8x11xbf16>,
    %c0_12 = arith.constant 0 : index
    %c91 = arith.constant 91 : index
    %17 = vector.load %arg10[%c0_12, %c91] : memref<8x102xbf16, #tpu.memory_space<vmem>>, vector<8x11xbf16>
    tpu.vector_store %arg10[%c0_12, %c91], %1 {strides = array<i32>} : memref<8x102xbf16, #tpu.memory_space<vmem>>, vector<8x11xbf16>,
    %18 = vector.broadcast %0 : vector<1x80xf32> to vector<8x80xf32>
    %19 = arith.mulf %15, %18 : vector<8x80xf32>
    %20 = arith.truncf %19 : vector<8x80xf32> to vector<8x80xbf16>
    %c0_13 = arith.constant 0 : index
    %c11 = arith.constant 11 : index
    %21 = vector.load %arg10[%c0_13, %c11] : memref<8x102xbf16, #tpu.memory_space<vmem>>, vector<8x80xbf16>
    tpu.vector_store %arg10[%c0_13, %c11], %20 {strides = array<i32>} : memref<8x102xbf16, #tpu.memory_space<vmem>>, vector<8x80xbf16>,
    %c0_14 = arith.constant 0 : index
    %c0_15 = arith.constant 0 : index
    %22 = vector.load %arg10[%c0_14, %c0_15] : memref<8x102xbf16, #tpu.memory_space<vmem>>, vector<8x80xbf16>
    %c0_16 = arith.constant 0 : index
    %c0_17 = arith.constant 0 : index
    %23 = vector.load %arg9[%c0_16, %c0_17] : memref<72x80xbf16, #tpu.memory_space<vmem>>, vector<8x80xbf16>
    tpu.vector_store %arg9[%c0_16, %c0_17], %22 {strides = array<i32>} : memref<72x80xbf16, #tpu.memory_space<vmem>>, vector<8x80xbf16>,
    %c0_18 = arith.constant 0 : index
    %c1 = arith.constant 1 : index
    %24 = vector.load %arg10[%c0_18, %c1] : memref<8x102xbf16, #tpu.memory_space<vmem>>, vector<8x80xbf16>
    %c8 = arith.constant 8 : index
    %c0_19 = arith.constant 0 : index
    %25 = vector.load %arg9[%c8, %c0_19] : memref<72x80xbf16, #tpu.memory_space<vmem>>, vector<8x80xbf16>
    tpu.vector_store %arg9[%c8, %c0_19], %24 {strides = array<i32>} : memref<72x80xbf16, #tpu.memory_space<vmem>>, vector<8x80xbf16>,
    %c0_20 = arith.constant 0 : index
    %c2 = arith.constant 2 : index
    %26 = vector.load %arg10[%c0_20, %c2] : memref<8x102xbf16, #tpu.memory_space<vmem>>, vector<8x80xbf16>
    %c16 = arith.constant 16 : index
    %c0_21 = arith.constant 0 : index
    %27 = vector.load %arg9[%c16, %c0_21] : memref<72x80xbf16, #tpu.memory_space<vmem>>, vector<8x80xbf16>
    tpu.vector_store %arg9[%c16, %c0_21], %26 {strides = array<i32>} : memref<72x80xbf16, #tpu.memory_space<vmem>>, vector<8x80xbf16>,
    %c0_22 = arith.constant 0 : index
    %c10 = arith.constant 10 : index
    %28 = vector.load %arg10[%c0_22, %c10] : memref<8x102xbf16, #tpu.memory_space<vmem>>, vector<8x80xbf16>
    %c24 = arith.constant 24 : index
    %c0_23 = arith.constant 0 : index
    %29 = vector.load %arg9[%c24, %c0_23] : memref<72x80xbf16, #tpu.memory_space<vmem>>, vector<8x80xbf16>
    tpu.vector_store %arg9[%c24, %c0_23], %28 {strides = array<i32>} : memref<72x80xbf16, #tpu.memory_space<vmem>>, vector<8x80xbf16>,
    %c0_24 = arith.constant 0 : index
    %c11_25 = arith.constant 11 : index
    %30 = vector.load %arg10[%c0_24, %c11_25] : memref<8x102xbf16, #tpu.memory_space<vmem>>, vector<8x80xbf16>
    %c32 = arith.constant 32 : index
    %c0_26 = arith.constant 0 : index
    %31 = vector.load %arg9[%c32, %c0_26] : memref<72x80xbf16, #tpu.memory_space<vmem>>, vector<8x80xbf16>
    tpu.vector_store %arg9[%c32, %c0_26], %30 {strides = array<i32>} : memref<72x80xbf16, #tpu.memory_space<vmem>>, vector<8x80xbf16>,
    %c0_27 = arith.constant 0 : index
    %c12 = arith.constant 12 : index
    %32 = vector.load %arg10[%c0_27, %c12] : memref<8x102xbf16, #tpu.memory_space<vmem>>, vector<8x80xbf16>
    %c40 = arith.constant 40 : index
    %c0_28 = arith.constant 0 : index
    %33 = vector.load %arg9[%c40, %c0_28] : memref<72x80xbf16, #tpu.memory_space<vmem>>, vector<8x80xbf16>
    tpu.vector_store %arg9[%c40, %c0_28], %32 {strides = array<i32>} : memref<72x80xbf16, #tpu.memory_space<vmem>>, vector<8x80xbf16>,
    %c0_29 = arith.constant 0 : index
    %c20 = arith.constant 20 : index
    %34 = vector.load %arg10[%c0_29, %c20] : memref<8x102xbf16, #tpu.memory_space<vmem>>, vector<8x80xbf16>
    %c48 = arith.constant 48 : index
    %c0_30 = arith.constant 0 : index
    %35 = vector.load %arg9[%c48, %c0_30] : memref<72x80xbf16, #tpu.memory_space<vmem>>, vector<8x80xbf16>
    tpu.vector_store %arg9[%c48, %c0_30], %34 {strides = array<i32>} : memref<72x80xbf16, #tpu.memory_space<vmem>>, vector<8x80xbf16>,
    %c0_31 = arith.constant 0 : index
    %c21 = arith.constant 21 : index
    %36 = vector.load %arg10[%c0_31, %c21] : memref<8x102xbf16, #tpu.memory_space<vmem>>, vector<8x80xbf16>
    %c56 = arith.constant 56 : index
    %c0_32 = arith.constant 0 : index
    %37 = vector.load %arg9[%c56, %c0_32] : memref<72x80xbf16, #tpu.memory_space<vmem>>, vector<8x80xbf16>
    tpu.vector_store %arg9[%c56, %c0_32], %36 {strides = array<i32>} : memref<72x80xbf16, #tpu.memory_space<vmem>>, vector<8x80xbf16>,
    %c0_33 = arith.constant 0 : index
    %c22 = arith.constant 22 : index
    %38 = vector.load %arg10[%c0_33, %c22] : memref<8x102xbf16, #tpu.memory_space<vmem>>, vector<8x80xbf16>
    %c64 = arith.constant 64 : index
    %c0_34 = arith.constant 0 : index
    %39 = vector.load %arg9[%c64, %c0_34] : memref<72x80xbf16, #tpu.memory_space<vmem>>, vector<8x80xbf16>
    tpu.vector_store %arg9[%c64, %c0_34], %38 {strides = array<i32>} : memref<72x80xbf16, #tpu.memory_space<vmem>>, vector<8x80xbf16>,
    %c0_35 = arith.constant 0 : index
    %c0_36 = arith.constant 0 : index
    %40 = vector.load %arg6[%c0_35, %c0_36] : memref<8x72xbf16, #tpu.memory_space<vmem>>, vector<8x72xbf16>
    %c0_37 = arith.constant 0 : index
    %c0_38 = arith.constant 0 : index
    %41 = vector.load %arg9[%c0_37, %c0_38] : memref<72x80xbf16, #tpu.memory_space<vmem>>, vector<72x80xbf16>
    %cst_39 = arith.constant dense<0.000000e+00> : vector<8x80xf32>
    %42 = tpu.matmul %40, %41, %cst_39 {dimension_numbers = #tpu.dot_dimension_numbers<[1], [0], [0], [1], [0, 0, 1, 1], [], []>} : vector<8x72xbf16>, vector<72x80xbf16>, vector<8x80xf32> -> vector<8x80xf32>
    %c0_40 = arith.constant 0 : index
    %c0_41 = arith.constant 0 : index
    %43 = vector.load %arg7[%c0_40, %c0_41] : memref<8x1xf32, #tpu.memory_space<vmem>>, vector<8x1xf32>
    %44 = vector.broadcast %43 : vector<8x1xf32> to vector<8x80xf32>
    %45 = arith.addf %42, %44 : vector<8x80xf32>
    %c0_42 = arith.constant 0 : index
    %c0_43 = arith.constant 0 : index
    %c0_44 = arith.constant 0 : index
    %46 = vector.load %arg2[%c0_42, %c0_43, %c0_44] : memref<1x8x80xf32, #tpu.memory_space<vmem>>, vector<1x8x80xf32>
    %47 = vector.shape_cast %46 : vector<1x8x80xf32> to vector<8x80xf32>
    %48 = arith.addf %45, %47 : vector<8x80xf32>
    %cst_45 = arith.constant 0.707106769 : f32
    %49 = vector.broadcast %cst_45 : f32 to vector<8x80xf32>
    %50 = arith.mulf %48, %49 : vector<8x80xf32>
    %c0_46 = arith.constant 0 : index
    %c0_47 = arith.constant 0 : index
    %c0_48 = arith.constant 0 : index
    %51 = vector.load %arg8[%c0_46, %c0_47, %c0_48] : memref<1x8x80xf32, #tpu.memory_space<vmem>>, vector<1x8x80xf32>
    %52 = vector.shape_cast %51 : vector<1x8x80xf32> to vector<8x80xf32>
    %53 = vector.shape_cast %50 : vector<8x80xf32> to vector<1x8x80xf32>
    tpu.vector_store %arg8[%c0_46, %c0_47, %c0_48], %53 {strides = array<i32>} : memref<1x8x80xf32, #tpu.memory_space<vmem>>, vector<1x8x80xf32>,
    return
  }
  func.func @transform_0(%arg0: i32) -> (i32, i32, i32) {
    %c0_i32 = arith.constant 0 : i32
    %c0_i32_0 = arith.constant 0 : i32
    %c0_i32_1 = arith.constant 0 : i32
    return %arg0, %c0_i32, %c0_i32_0 : i32, i32, i32
  }
  func.func @transform_1(%arg0: i32) -> (i32, i32, i32) {
    %c0_i32 = arith.constant 0 : i32
    %c0_i32_0 = arith.constant 0 : i32
    %c0_i32_1 = arith.constant 0 : i32
    return %arg0, %c0_i32, %c0_i32_0 : i32, i32, i32
  }
  func.func @transform_2(%arg0: i32) -> (i32, i32) {
    %c0_i32 = arith.constant 0 : i32
    %c0_i32_0 = arith.constant 0 : i32
    %c0_i32_1 = arith.constant 0 : i32
    return %c0_i32, %c0_i32_0 : i32, i32
  }
  func.func @transform_3(%arg0: i32) -> (i32, i32) {
    %c0_i32 = arith.constant 0 : i32
    %c0_i32_0 = arith.constant 0 : i32
    %c0_i32_1 = arith.constant 0 : i32
    return %c0_i32, %c0_i32_0 : i32, i32
  }
  func.func @transform_4(%arg0: i32) -> (i32, i32) {
    %c0_i32 = arith.constant 0 : i32
    %c0_i32_0 = arith.constant 0 : i32
    %c0_i32_1 = arith.constant 0 : i32
    return %c0_i32, %c0_i32_0 : i32, i32
  }
  func.func @transform_5(%arg0: i32) -> (i32, i32) {
    %c0_i32 = arith.constant 0 : i32
    %c0_i32_0 = arith.constant 0 : i32
    %c0_i32_1 = arith.constant 0 : i32
    return %c0_i32, %c0_i32_0 : i32, i32
  }
  func.func @transform_6(%arg0: i32) -> (i32, i32) {
    %c0_i32 = arith.constant 0 : i32
    %c0_i32_0 = arith.constant 0 : i32
    %c0_i32_1 = arith.constant 0 : i32
    return %c0_i32, %c0_i32_0 : i32, i32
  }
  func.func @transform_7(%arg0: i32) -> (i32, i32, i32) {
    %c0_i32 = arith.constant 0 : i32
    %c0_i32_0 = arith.constant 0 : i32
    %c0_i32_1 = arith.constant 0 : i32
    return %arg0, %c0_i32, %c0_i32_0 : i32, i32, i32
  }
}

</mosaic_0001>

<bundles_post_ra>
// kernel: down_res_forward.2
= control target key start
LH: loop header
LB: loop body
LE: loop exit
PB: predicated region body
PF: predicated region fallthrough
CT: control target
= control target key end

     0   :  { %s922_s13 = smov 0   ;;  %s1009_s0 = inlined_call_operand.vmem [shape: bf16[2,16,100], index: 0, kind: input, shape index: {}]   ;;  %s1010_s1 = inlined_call_operand.vmem [shape: f32[1,80], index: 1, kind: input, shape index: {}]   ;;  %s1011_s2 = inlined_call_operand.vmem [shape: bf16[4,64], index: 2, kind: input, shape index: {}]   ;;  %s1012_s3 = inlined_call_operand.vmem [shape: f32[4,1], index: 3, kind: input, shape index: {}]   ;;  %s1013_s4 = inlined_call_operand.vmem [shape: bf16[8,4], index: 4, kind: input, shape index: {}]   ;;  %s1014_s5 = inlined_call_operand.vmem [shape: f32[8,1], index: 5, kind: input, shape index: {}]   ;;  %s1015_s6 = inlined_call_operand.vmem [shape: bf16[8,72], index: 6, kind: input, shape index: {}]   ;;  %s1016_s7 = inlined_call_operand.vmem [shape: f32[8,1], index: 7, kind: input, shape index: {}]   ;;  %s1017_s8 = inlined_call_operand.vmem [shape: f32[2,8,80], index: 8, kind: output, shape index: {0}]   ;;  %s1018_s9 = inlined_call_operand.vmem [shape: bf16[2,8,80], index: 9, kind: output, shape index: {1}]   ;;  %s1019_s10 = inlined_call_operand.vmem [shape: f32[2,8,2], index: 10, kind: output, shape index: {2}]  }
   0x1 LB: > { %s772_s14 = sadd.s32 4294967295, %s855_s13   ;;  %p776_p0 = scmp.ge.s32.totalorder %s855_s13, 1  ;;  %s855_s13 = sphi %s922_s13, %s21_s13  }
   0x2   : > { %p317_p1 = scmp.lt.s32.totalorder %s855_s13, 3 }
   0x4   : > { %p318_p2 = pnand %p776_p0, %p317_p1 }
   0x5   : > { %p362_p3 = scmp.lt.s32.totalorder (!%p318_p2), %s772_s14, 1  ;;  %s857_s19 = smov (!%p318_p2), 117  }
   0x6   : > { %321 = sbr.rel (%p318_p2) target bundleno = 933 (0x3a5), region = 52  ;;  %s858_s20 = smov (!%p318_p2), 118  }
   0x7   : > { %s859_s21 = smov (!%p318_p2), 127   ;;  %s862_s22 = smov (!%p318_p2), 106  }
   0x8   : > { %s863_s23 = smov (!%p318_p2), 107   ;;  %s864_s24 = smov (!%p318_p2), 108  }
   0x9   : > { %s865_s25 = smov (!%p318_p2), 126   ;;  %s866_s26 = smov (!%p318_p2), 116  }
   0xb   : > { %s1021_s14 = smov (!%p362_p3, %s772_s14), 1  ;;  %vm383_vm0 = vcmask 650240   ;;  %v431_v12 = vld [vmem:[%s1012_s3] sm:$0xf]  ;;  %v860_v13 = vmov 0   ;;  %vm461_vm1 = vcmask 523264  }
   0xc   : > { %s933_s15 = sshll.u32 %s1021_s14, 3  ;;  %846 = vset.pattern.permute.xlu0 %v860_v13  ;;  %847 = vset.pattern.permute.xlu1 %v860_v13  ;;  %v422_v20 = vld [vmem:[%s1011_s2] sm:$0x3]  ;;  %vm493_vm3 = vcmask 1041408   ;;  %vm489_vm4 = vcmask 31744   ;;  %vm512_vm5 = vcmask 84992  }
   0xd   : > { %s366_s18 = scalar_lea.vmem %s1009_s0, %s933_s15  ;;  %v483_v21 = vld [vmem:[%s1014_s5] sm:$0xff]  ;;  %vm514_vm6 = vcmask 831192   ;;  %513 = vst.msk [vmem:[#allocation4] sm:$0xf] %vm512_vm5, %v860_v13  ;;  %s370_s17 = scalar_lea.vmem %s1017_s8, %s933_s15  ;;  %vm510_vm7 = vcmask 654336   ;;  %vm525_vm8 = vcmask 740440  }
   0xe   : > { %v410_v0 = vld [vmem:[%s366_s18] sm:$0xf]  ;;  %v382_v2 = vld [vmem:[%s366_s18 + $0x4] sm:$0xf]  ;;  %515 = vst.msk [vmem:[#allocation4] sm:$0xf] %vm514_vm6, %v860_v13  ;;  %s378_s16 = scalar_lea.vmem %s1019_s10, %s933_s15 }
   0xf   : > { %v381_v1 = vld [vmem:[%s366_s18] sm:$0xf]  ;;  %414 = vrot.lane.b32.xlu0 %v410_v0, %s857_s19  ;;  %385 = vst.msk [vmem:[#allocation2 + $0x4] sm:$0xf] %vm383_vm0, %v382_v2  ;;  %v411_v5 = vld [vmem:[%s366_s18 + $0x4] sm:$0xf] }
  0x10   : > { %384 = vst.msk [vmem:[#allocation2] sm:$0xf] %vm383_vm0, %v381_v1  ;;  %v398_v3 = vld [vmem:[%s366_s18] sm:$0xf]  ;;  %v399_v6 = vld [vmem:[%s366_s18 + $0x4] sm:$0xf] }
  0x11   : > { %402 = vrot.lane.b32.xlu1 %v398_v3, %s858_s20  ;;  %v386_v4 = vld [vmem:[%s366_s18] sm:$0xf]  ;;  %v387_v7 = vld [vmem:[%s366_s18 + $0x4] sm:$0xf]  ;;  %s861_s18 = smov 11   ;;  %vm624_vm9 = vcmask 1043456  }
  0x12   : > { %390 = vrot.lane.b32.xlu2 %v386_v4, %s859_s21  ;;  %v481_v30 = vld [vmem:[%s1013_s4] sm:$0xf]  ;;  %vm620_vm10 = vcmask 588800   ;;  %vm653_vm11 = vcmask 7168   ;;  %vm655_vm12 = vcmask 15368  }
  0x13   : > { %v968_v32 = vld [vmem:[%s1010_s1] ss:$0 sm:$0xff] }
  0x14   : > { %v587_v46 = vld [vmem:[%s1016_s7] sm:$0xff] }
  0x15   : > { %v577_v1 = vld [vmem:[%s1015_s6] sm:$0xf] }
  0x17   : > { %416 = vrot.lane.b32.xlu0 %v411_v5, %s857_s19  ;;  %v820_v19 = vld [vmem:[#allocation2] sm:$0xff] }
  0x19   : > { %404 = vrot.lane.b32.xlu1 %v399_v6, %s858_s20 }
  0x1a   : > { %392 = vrot.lane.b32.xlu2 %v387_v7, %s859_s21 }
  0x1f   : > { %434 = vperm.xlu0 %846, %v431_v12  }
  0x21   : > { %486 = vperm.xlu1 %847, %v483_v21  }
  0x6c   : > { %v391_v8 = vpop.permute.xlu2 %390 }
  0x6d   : > { %396 = vst.msk [vmem:[#allocation2 + $0x8] sm:$0xf] %vm383_vm0, %v391_v8 }
  0x74   : > { %v393_v9 = vpop.permute.xlu2 %392 }
  0x75   : > { %397 = vst.msk [vmem:[#allocation2 + $0xc] sm:$0xf] %vm383_vm0, %v393_v9 }
  0x7c   : > { %v821_v18 = vld [vmem:[#allocation2 + $0x8] sm:$0xff] }
  0x81   : > { %v415_v10 = vpop.permute.xlu0 %414 }
  0x82   : > { %420 = vst.msk [vmem:[#allocation2 + $0x18] sm:$0xf] %vm383_vm0, %v415_v10 }
  0x83   : > { %v403_v11 = vpop.permute.xlu1 %402 }
  0x84   : > { %408 = vst.msk [vmem:[#allocation2 + $0x10] sm:$0xf] %vm383_vm0, %v403_v11 }
  0x89   : > { %v417_v14 = vpop.permute.xlu0 %416 }
  0x8a   : > { %421 = vst.msk [vmem:[#allocation2 + $0x1c] sm:$0xf] %vm383_vm0, %v417_v14 }
  0x8b   : > { %v405_v15 = vpop.permute.xlu1 %404 }
  0x8c   : > { %409 = vst.msk [vmem:[#allocation2 + $0x14] sm:$0xf] %vm383_vm0, %v405_v15 }
  0x91   : > { %v823_v16 = vld [vmem:[#allocation2 + $0x18] sm:$0xff]  ;;  %v435_v22 = vpop.permute.xlu0 %434 }
  0x92   : > { %469 = vmatpush.bf16.msra.mxu0 %v823_v16 }
  0x93   : > { %v822_v17 = vld [vmem:[#allocation2 + $0x10] sm:$0xff]  ;;  %v487_v31 = vpop.permute.xlu1 %486 }
  0x96   : > { %470 = vmatpush.bf16.msra.mxu0 %v822_v17 }
  0x9a   : > { %471 = vmatpush.bf16.msra.mxu0 %v821_v18 }
  0x9e   : > { %472 = vmatpush.bf16.msra.mxu0 %v820_v19 }
  0xa1   : > { %798 = vmatmul.msk.bf16.vlgmr.msra.gmra.mxu0 %vm461_vm1, %v422_v20 }
 0x11e   : > { %v474_v23 = vpop.f32.mrf.mxu0 }
 0x11f   : > { %v475_v24 = vadd.f32 %v474_v23, %v435_v22 }
 0x121   : > { %v479_v25 = vmul.f32 0.1, %v475_v24  ;;  %vm478_vm2 = vcmp.ge.f32.partialorder %v475_v24, 0.0 }
 0x123   : > { %v480_v26 = vsel %vm478_vm2, %v475_v24, %v479_v25 }
 0x124   : > { %v482_v27 = vpack.c.bf16 %v480_v26, %v480_v26 }
 0x126   : > { %v476_v28 = vpop.f32.mrf.mxu0  ;;  %v495_v29 = vsel %vm493_vm3, %v482_v27, 0 }
 0x127   : > { %504 = vmatpush.bf16.msra.mxu1 %v495_v29 }
 0x12a   : > { %799 = vmatmul.msk.bf16.vlgmr.msra.gmra.mxu1 %vm489_vm4, %v481_v30 }
 0x1a7   : > { %v506_v33 = vpop.f32.mrf.mxu1 }
 0x1a8   : > { %v507_v34 = vadd.f32 %v506_v33, %v487_v31 }
 0x1aa   : > { %v519_v35 = vmul.f32 %v968_v32, %v507_v34  ;;  %511 = vst.msk [vmem:[%s370_s17] sm:$0xff] %vm510_vm7, %v507_v34 }
 0x1ac   : > { %v520_v36 = vpack.c.bf16 %v519_v35, %v519_v35 }
 0x1ae   : > { %522 = vrot.lane.b32.xlu2 %v520_v36, %s861_s18 }
 0x1af   : > { %v508_v37 = vpop.f32.mrf.mxu1 }
 0x208   : > { %v523_v38 = vpop.permute.xlu2 %522 }
 0x209   : > { %526 = vst.msk [vmem:[#allocation4] sm:$0xf] %vm525_vm8, %v523_v38 }
 0x210   : > { %v527_v39 = vld [vmem:[#allocation4] sm:$0xf] }
 0x211   : > { %v571_v40 = vld [vmem:[#allocation4] sm:$0xf]  ;;  %528 = vst.msk [vmem:[#allocation3] sm:$0xf] %vm383_vm0, %v527_v39 }
 0x212   : > { %v565_v41 = vld [vmem:[#allocation4] sm:$0xf]  ;;  %573 = vrot.lane.b32.xlu1 %v571_v40, %s862_s22 }
 0x213   : > { %567 = vrot.lane.b32.xlu0 %v565_v41, %s863_s23  ;;  %v559_v42 = vld [vmem:[#allocation4] sm:$0xf] }
 0x214   : > { %561 = vrot.lane.b32.xlu2 %v559_v42, %s864_s24  ;;  %v547_v43 = vld [vmem:[#allocation4] sm:$0xf] }
 0x215   : > { %v535_v44 = vld [vmem:[#allocation4] sm:$0xf] }
 0x216   : > { %v553_v45 = vld [vmem:[#allocation4] sm:$0xf] }
 0x217   : > { %v541_v47 = vld [vmem:[#allocation4] sm:$0xf] }
 0x218   : > { %v529_v48 = vld [vmem:[#allocation4] sm:$0xf] }
 0x21a   : > { %549 = vrot.lane.b32.xlu1 %v547_v43, %s857_s19 }
 0x21b   : > { %537 = vrot.lane.b32.xlu0 %v535_v44, %s865_s25 }
 0x21c   : > { %555 = vrot.lane.b32.xlu2 %v553_v45, %s866_s26 }
 0x222   : > { %543 = vrot.lane.b32.xlu1 %v541_v47, %s858_s20 }
 0x223   : > { %590 = vperm.xlu0 %846, %v587_v46  }
 0x224   : > { %531 = vrot.lane.b32.xlu2 %v529_v48, %s859_s21  ;;  %s780_s21 = sshll.u32 %s1021_s14, 2 }
 0x225   : > { %s374_s11 = scalar_lea.vmem %s1018_s9, %s780_s21 }
 0x26e   : > { %v562_v49 = vpop.permute.xlu2 %561 }
 0x26f   : > { %564 = vst.msk [vmem:[#allocation3 + $0x18] sm:$0xf] %vm383_vm0, %v562_v49 }
 0x276   : > { %v556_v50 = vpop.permute.xlu2 %555 }
 0x277   : > { %558 = vst.msk [vmem:[#allocation3 + $0x14] sm:$0xf] %vm383_vm0, %v556_v50 }
 0x27e   : > { %v532_v51 = vpop.permute.xlu2 %531 }
 0x27f   : > { %534 = vst.msk [vmem:[#allocation3 + $0x4] sm:$0xf] %vm383_vm0, %v532_v51 }
 0x284   : > { %v574_v52 = vpop.permute.xlu1 %573 }
 0x285   : > { %v568_v53 = vpop.permute.xlu0 %567  ;;  %576 = vst.msk [vmem:[#allocation3 + $0x20] sm:$0xf] %vm383_vm0, %v574_v52 }
 0x286   : > { %570 = vst.msk [vmem:[#allocation3 + $0x1c] sm:$0xf] %vm383_vm0, %v568_v53  ;;  %v824_v0 = vld [vmem:[#allocation3] sm:$0xff] }
 0x28c   : > { %v550_v54 = vpop.permute.xlu1 %549  ;;  %v586_v56 = vld [vmem:[#allocation3 + $0x20] sm:$0xf] }
 0x28d   : > { %v538_v55 = vpop.permute.xlu0 %537  ;;  %552 = vst.msk [vmem:[#allocation3 + $0x10] sm:$0xf] %vm383_vm0, %v550_v54  ;;  %v610_v57 = vunpack.c.l.b16 %v586_v56  ;;  %v827_v61 = vld [vmem:[#allocation3 + $0x18] sm:$0xff] }
 0x28e   : > { %540 = vst.msk [vmem:[#allocation3 + $0x8] sm:$0xf] %vm383_vm0, %v538_v55 }
 0x28f   : > { %v615_v58 = vpack.c.b16 %v610_v57, %v610_v57 }
 0x291   : > { %v626_v59 = vsel %vm624_vm9, %v615_v58, 0 }
 0x292   : > { %631 = vmatpush.bf16.msra.mxu2 %v626_v59 }
 0x294   : > { %v544_v60 = vpop.permute.xlu1 %543  ;;  %v826_v62 = vld [vmem:[#allocation3 + $0x10] sm:$0xff] }
 0x295   : > { %546 = vst.msk [vmem:[#allocation3 + $0xc] sm:$0xf] %vm383_vm0, %v544_v60  ;;  %v591_v2 = vpop.permute.xlu0 %590 }
 0x296   : > { %632 = vmatpush.bf16.msra.mxu2 %v827_v61 }
 0x29a   : > { %633 = vmatpush.bf16.msra.mxu2 %v826_v62 }
 0x29c   : > { %v825_v63 = vld [vmem:[#allocation3 + $0x8] sm:$0xff] }
 0x29e   : > { %634 = vmatpush.bf16.msra.mxu2 %v825_v63 }
 0x2a2   : > { %635 = vmatpush.bf16.msra.mxu2 %v824_v0 }
 0x2a5   : > { %816 = vmatmul.msk.bf16.vlgmr.msra.gmra.mxu2 %vm620_vm10, %v577_v1 }
 0x328   : > { %v637_v3 = vpop.f32.mrf.mxu2 }
 0x329   : > { %v638_v4 = vadd.f32 %v637_v3, %v591_v2 }
 0x32b   : > { %v641_v5 = vpack.c.bf16 %v638_v4, %v638_v4  ;;  %v643_v6 = vmul.f32 %v968_v32, %v638_v4 }
 0x32d   : > { %642 = vst.msk [vmem:[%s374_s11] sm:$0xf] %vm383_vm0, %v641_v5  ;;  %v644_v7 = vsel %vm510_vm7, %v643_v6, 0.0  ;;  %v648_v8 = vmul.f32 %v643_v6, %v643_v6 }
 0x32e   : > { %645 = vadd.xlane.f32.xlu1 %v644_v7 }
 0x32f   : > { %v649_v9 = vsel %vm510_vm7, %v648_v8, 0.0 }
 0x330   : > { %v639_v10 = vpop.f32.mrf.mxu2  ;;  %650 = vadd.xlane.f32.xlu2 %v649_v9 }
 0x3a1   : > { %v646_v11 = vpop.xlane.xlu1 %645 }
 0x3a2   : > { %654 = vst.msk [vmem:[%s378_s16] sm:$0xff] %vm653_vm11, %v646_v11 }
 0x3a3   : > { %v651_v12 = vpop.xlane.xlu2 %650 }
 0x3a4   : > { %656 = vst.msk [vmem:[%s378_s16] sm:$0xff] %vm655_vm12, %v651_v12 }
 0x3a5 PF: > { %s21_s13 = sadd.s32 1, %s855_s13  }
 0x3a6   : > { %p18_p4 = scmp.ge.s32.totalorder %s21_s13, 4  }
 0x3a8   :  { %20 = sbr.rel (!%p18_p4) target bundleno = 1 (0x1), region = 106 }

// kernel: down_res_forward.3
= control target key start
LH: loop header
LB: loop body
LE: loop exit
PB: predicated region body
PF: predicated region fallthrough
CT: control target
= control target key end

     0   :  { %s622_s24 = smov 0   ;;  %s670_s0 = inlined_call_operand.vmem [shape: bf16[2,8,80], index: 0, kind: input, shape index: {}]   ;;  %s671_s1 = inlined_call_operand.vmem [shape: f32[2,8,80], index: 1, kind: input, shape index: {}]   ;;  %s672_s2 = inlined_call_operand.vmem [shape: f32[1,80], index: 2, kind: input, shape index: {}]   ;;  %s673_s3 = inlined_call_operand.vmem [shape: f32[8,1], index: 3, kind: input, shape index: {}]   ;;  %s674_s4 = inlined_call_operand.vmem [shape: f32[8,1], index: 4, kind: input, shape index: {}]   ;;  %s675_s5 = inlined_call_operand.vmem [shape: bf16[8,72], index: 5, kind: input, shape index: {}]   ;;  %s676_s6 = inlined_call_operand.vmem [shape: f32[8,1], index: 6, kind: input, shape index: {}]   ;;  %s677_s7 = inlined_call_operand.vmem [shape: f32[2,8,80], index: 7, kind: output, shape index: {}]  }
   0x1 LB: > { %s512_s25 = sadd.s32 4294967295, %s570_s24   ;;  %p516_p0 = scmp.ge.s32.totalorder %s570_s24, 1  ;;  %s570_s24 = sphi %s622_s24, %s17_s24  }
   0x2   : > { %p245_p1 = scmp.lt.s32.totalorder %s570_s24, 3 }
   0x4   : > { %p246_p2 = pnand %p516_p0, %p245_p1 }
   0x5   : > { %p279_p3 = scmp.lt.s32.totalorder (!%p246_p2), %s512_s25, 1  ;;  %s573_s13 = smov (!%p246_p2), 11  }
   0x6   : > { %249 = sbr.rel (%p246_p2) target bundleno = 550 (0x226), region = 48  ;;  %s574_s14 = smov (!%p246_p2), 106  }
   0x7   : > { %s575_s15 = smov (!%p246_p2), 108   ;;  %s576_s16 = smov (!%p246_p2), 117  }
   0x8   : > { %s577_s17 = smov (!%p246_p2), 107   ;;  %s578_s18 = smov (!%p246_p2), 116  }
   0x9   : > { %s579_s19 = smov (!%p246_p2), 118   ;;  %s580_s20 = smov (!%p246_p2), 126  }
   0xa   : > { %s581_s21 = smov (!%p246_p2), 127  }
   0xb   : > { %v295_v0 = vld [vmem:[%s673_s3] sm:$0xff]  ;;  %v572_v1 = vmov 0   ;;  %vm312_vm0 = vcmask 84992   ;;  %vm314_vm1 = vcmask 831192   ;;  %s679_s25 = smov (!%p279_p3, %s512_s25), 1  ;;  %vm325_vm3 = vcmask 740440  }
   0xc   : > { %561 = vset.pattern.permute.xlu0 %v572_v1  ;;  %562 = vset.pattern.permute.xlu2 %v572_v1  ;;  %v302_v2 = vld [vmem:[%s674_s4] sm:$0xff]  ;;  %313 = vst.msk [vmem:[#allocation3] sm:$0xf] %vm312_vm0, %v572_v1  ;;  %s517_s30 = sshll.u32 %s679_s25, 2  ;;  %vm328_vm4 = vcmask 650240   ;;  %vm425_vm5 = vcmask 1043456  }
   0xd   : > { %298 = vperm.xlu0 %561, %v295_v0   ;;  %315 = vst.msk [vmem:[#allocation3] sm:$0xf] %vm314_vm1, %v572_v1  ;;  %s282_s10 = scalar_lea.vmem %s670_s0, %s517_s30  ;;  %v563_v9 = vld [vmem:[%s672_s2] ss:$0 sm:$0xff]  ;;  %vm421_vm6 = vcmask 588800   ;;  %s518_s28 = sshll.u32 %s679_s25, 3 }
   0xe   : > { %v293_v4 = vld [vmem:[%s282_s10] sm:$0xf]  ;;  %s286_s8 = scalar_lea.vmem %s671_s1, %s518_s28  ;;  %s290_s11 = scalar_lea.vmem %s677_s7, %s518_s28  ;;  %vm445_vm7 = vcmask 654336  }
   0xf   : > { %v294_v5 = vunpack.c.l.bf16 %v293_v4  ;;  %v388_v29 = vld [vmem:[%s676_s6] sm:$0xff] }
  0x10   : > { %v378_v41 = vld [vmem:[%s675_s5] sm:$0xf] }
  0x11   : > { %v442_v44 = vld [vmem:[%s286_s8] sm:$0xff] }
  0x15   : > { %305 = vperm.xlu0 %561, %v302_v2  }
  0x7f   : > { %v299_v3 = vpop.permute.xlu0 %298 }
  0x80   : > { %v301_v6 = vmul.f32 %v299_v3, %v294_v5 }
  0x87   : > { %v306_v7 = vpop.permute.xlu0 %305 }
  0x88   : > { %v308_v8 = vadd.f32 %v306_v7, %v301_v6 }
  0x8a   : > { %vm309_vm2 = vcmp.ge.f32.partialorder %v308_v8, 0.0  ;;  %v310_v10 = vmul.f32 0.2, %v308_v8 }
  0x8c   : > { %v311_v11 = vsel %vm309_vm2, %v308_v8, %v310_v10 }
  0x8d   : > { %v319_v12 = vmul.f32 %v563_v9, %v311_v11 }
  0x8f   : > { %v320_v13 = vpack.c.bf16 %v319_v12, %v319_v12 }
  0x91   : > { %322 = vrot.lane.b32.xlu1 %v320_v13, %s573_s13 }
 0x103   : > { %v323_v14 = vpop.permute.xlu1 %322 }
 0x104   : > { %326 = vst.msk [vmem:[#allocation3] sm:$0xf] %vm325_vm3, %v323_v14 }
 0x10b   : > { %v327_v15 = vld [vmem:[#allocation3] sm:$0xf] }
 0x10c   : > { %v372_v16 = vld [vmem:[#allocation3] sm:$0xf]  ;;  %329 = vst.msk [vmem:[#allocation2] sm:$0xf] %vm328_vm4, %v327_v15 }
 0x10d   : > { %v360_v17 = vld [vmem:[#allocation3] sm:$0xf]  ;;  %374 = vrot.lane.b32.xlu1 %v372_v16, %s574_s14 }
 0x10e   : > { %362 = vrot.lane.b32.xlu2 %v360_v17, %s575_s15  ;;  %v348_v18 = vld [vmem:[#allocation3] sm:$0xf] }
 0x10f   : > { %350 = vrot.lane.b32.xlu0 %v348_v18, %s576_s16  ;;  %v366_v19 = vld [vmem:[#allocation3] sm:$0xf] }
 0x110   : > { %v354_v20 = vld [vmem:[#allocation3] sm:$0xf] }
 0x111   : > { %v342_v21 = vld [vmem:[#allocation3] sm:$0xf] }
 0x112   : > { %v336_v22 = vld [vmem:[#allocation3] sm:$0xf] }
 0x113   : > { %v330_v23 = vld [vmem:[#allocation3] sm:$0xf] }
 0x115   : > { %356 = vrot.lane.b32.xlu1 %v354_v20, %s578_s18 }
 0x116   : > { %368 = vrot.lane.b32.xlu2 %v366_v19, %s577_s17 }
 0x117   : > { %344 = vrot.lane.b32.xlu0 %v342_v21, %s579_s19 }
 0x11d   : > { %332 = vrot.lane.b32.xlu1 %v330_v23, %s581_s21 }
 0x11e   : > { %338 = vrot.lane.b32.xlu2 %v336_v22, %s580_s20 }
 0x126   : > { %391 = vperm.xlu2 %562, %v388_v29  }
 0x168   : > { %v363_v24 = vpop.permute.xlu2 %362 }
 0x169   : > { %365 = vst.msk [vmem:[#allocation2 + $0x18] sm:$0xf] %vm328_vm4, %v363_v24 }
 0x170   : > { %v369_v25 = vpop.permute.xlu2 %368 }
 0x171   : > { %371 = vst.msk [vmem:[#allocation2 + $0x1c] sm:$0xf] %vm328_vm4, %v369_v25 }
 0x178   : > { %v339_v26 = vpop.permute.xlu2 %338  ;;  %v542_v37 = vld [vmem:[#allocation2 + $0x18] sm:$0xff] }
 0x179   : > { %341 = vst.msk [vmem:[#allocation2 + $0x8] sm:$0xf] %vm328_vm4, %v339_v26 }
 0x17f   : > { %v375_v27 = vpop.permute.xlu1 %374 }
 0x180   : > { %377 = vst.msk [vmem:[#allocation2 + $0x20] sm:$0xf] %vm328_vm4, %v375_v27  ;;  %v392_v42 = vpop.permute.xlu2 %391 }
 0x181   : > { %v351_v28 = vpop.permute.xlu0 %350 }
 0x182   : > { %353 = vst.msk [vmem:[#allocation2 + $0x10] sm:$0xf] %vm328_vm4, %v351_v28 }
 0x187   : > { %v357_v30 = vpop.permute.xlu1 %356  ;;  %v387_v31 = vld [vmem:[#allocation2 + $0x20] sm:$0xf] }
 0x188   : > { %359 = vst.msk [vmem:[#allocation2 + $0x14] sm:$0xf] %vm328_vm4, %v357_v30  ;;  %v411_v33 = vunpack.c.l.b16 %v387_v31 }
 0x189   : > { %v345_v32 = vpop.permute.xlu0 %344 }
 0x18a   : > { %347 = vst.msk [vmem:[#allocation2 + $0xc] sm:$0xf] %vm328_vm4, %v345_v32  ;;  %v416_v34 = vpack.c.b16 %v411_v33, %v411_v33 }
 0x18c   : > { %v427_v35 = vsel %vm425_vm5, %v416_v34, 0 }
 0x18d   : > { %432 = vmatpush.bf16.msra.mxu0 %v427_v35 }
 0x18f   : > { %v333_v36 = vpop.permute.xlu1 %332  ;;  %v541_v38 = vld [vmem:[#allocation2 + $0x10] sm:$0xff] }
 0x190   : > { %335 = vst.msk [vmem:[#allocation2 + $0x4] sm:$0xf] %vm328_vm4, %v333_v36 }
 0x191   : > { %433 = vmatpush.bf16.msra.mxu0 %v542_v37  ;;  %v540_v39 = vld [vmem:[#allocation2 + $0x8] sm:$0xff] }
 0x195   : > { %434 = vmatpush.bf16.msra.mxu0 %v541_v38 }
 0x197   : > { %v539_v40 = vld [vmem:[#allocation2] sm:$0xff] }
 0x199   : > { %435 = vmatpush.bf16.msra.mxu0 %v540_v39 }
 0x19d   : > { %436 = vmatpush.bf16.msra.mxu0 %v539_v40 }
 0x1a0   : > { %536 = vmatmul.msk.bf16.vlgmr.msra.gmra.mxu0 %vm421_vm6, %v378_v41 }
 0x21d   : > { %v438_v43 = vpop.f32.mrf.mxu0 }
 0x21e   : > { %v439_v45 = vadd.f32 %v438_v43, %v392_v42 }
 0x220   : > { %v443_v46 = vadd.f32 %v442_v44, %v439_v45 }
 0x222   : > { %v444_v47 = vmul.f32 0.70710677, %v443_v46 }
 0x224   : > { %446 = vst.msk [vmem:[%s290_s11] sm:$0xff] %vm445_vm7, %v444_v47 }
 0x225   : > { %v440_v48 = vpop.f32.mrf.mxu0 }
 0x226 PF: > { %s17_s24 = sadd.s32 1, %s570_s24  }
 0x227   : > { %p14_p4 = scmp.ge.s32.totalorder %s17_s24, 4  }
 0x229   :  { %16 = sbr.rel (!%p14_p4) target bundleno = 1 (0x1), region = 81 }

</bundles_post_ra>
